<compile_context>
chip_gen: v6e
topology: v6e:2x2x1
jax: 0.10.0
libtpu: 0.0.40
codegen_flags: <defaults>
</compile_context>

<pallas_src>
import jax
import jax.numpy as jnp
from jax import lax
from jax.experimental import pallas as pl
from jax.experimental.pallas import tpu as pltpu  # noqa: F401  (TPU backend)


def _linear_add_kernel(x1_ref, w_ref, b_ref, x2_ref, o_ref):
    # x1: (M, K), w: (K, N) (pre-transposed at init), b: (1, N), x2: (M, N).
    # Single MXU matmul with f32 accumulation; bias + residual add on the VPU.
    acc = lax.dot_general(
        x1_ref[...], w_ref[...],
        dimension_numbers=(((1,), (0,)), ((), ())),
        preferred_element_type=jnp.float32,
    )
    o_ref[...] = (acc + b_ref[...] + x2_ref[...]).astype(o_ref.dtype)


def linear_add(x1, weight_t, bias_row, x2):
    """x1 @ weight_t + bias_row + x2, single grid-less Pallas call.

    weight_t: (K, N) — nn.Linear weight transposed ONCE at init time.
    bias_row: (1, N) — shaped once at parameter-init time.
    """
    M, K = x1.shape
    N = weight_t.shape[1]

    cost = pl.CostEstimate(
        flops=2 * M * K * N,
        transcendentals=0,
        bytes_accessed=4 * (M * K + K * N + N + 2 * M * N),
    )

    return pl.pallas_call(
        _linear_add_kernel,
        out_shape=jax.ShapeDtypeStruct((M, N), x1.dtype),
        in_specs=[
            pl.BlockSpec((M, K), lambda: (0, 0)),
            pl.BlockSpec((K, N), lambda: (0, 0)),
            pl.BlockSpec((1, N), lambda: (0, 0)),
            pl.BlockSpec((M, N), lambda: (0, 0)),
        ],
        out_specs=pl.BlockSpec((M, N), lambda: (0, 0)),
        cost_estimate=cost,
    )(x1, weight_t, bias_row, x2)


if __name__ == "__main__":
    key = jax.random.PRNGKey(0)
    k1, k2, k3, k4, k5 = jax.random.split(key, 5)

    M, IN, OUT = 20, 10, 10

    # Deterministic inputs (analogue of torch.randn(20, 10))
    x1 = jax.random.normal(k1, (M, IN), dtype=jnp.float32)
    x2 = jax.random.normal(k2, (M, OUT), dtype=jnp.float32)
    other = jax.random.normal(k3, (M, OUT), dtype=jnp.float32)  # unused, matches signature

    # Deterministic parameter init (nn.Linear(10, 10)): weight (OUT, IN), bias (OUT,).
    # One-time init-time layout work (outside the hot path):
    #   weight -> (IN, OUT) pre-transposed; bias -> (1, OUT) row.
    bound = 1.0 / jnp.sqrt(IN)
    weight = jax.random.uniform(k4, (OUT, IN), minval=-bound, maxval=bound,
                                dtype=jnp.float32)
    bias = jax.random.uniform(k5, (OUT,), minval=-bound, maxval=bound,
                              dtype=jnp.float32)
    weight_t = jnp.asarray(weight.T)          # (K, N), done once at init
    bias_row = bias.reshape(1, OUT)           # (1, N), done once at init

    out = linear_add(x1, weight_t, bias_row, x2)
    jax.block_until_ready(out)

    # Pure-JAX reference check (original module semantics: linear(x1) + x2)
    ref = x1 @ weight.T + bias + x2
    assert out.shape == (M, OUT)
    assert jnp.allclose(out, ref, atol=1e-5, rtol=1e-5)

    print("KERNEL_OK")
</pallas_src>

<mosaic_0001>
module attributes {stable_mosaic.version = 11 : i64} {
  func.func @_linear_add_kernel(%arg0: memref<20x10xf32, #tpu.memory_space<vmem>>, %arg1: memref<10x10xf32, #tpu.memory_space<vmem>>, %arg2: memref<1x10xf32, #tpu.memory_space<vmem>>, %arg3: memref<20x10xf32, #tpu.memory_space<vmem>>, %arg4: memref<20x10xf32, #tpu.memory_space<vmem>>) attributes {dimension_semantics = [], scalar_prefetch = 0 : i64, scratch_operands = 0 : i64, tpu.core_type = #tpu.core_type<tc>} {
    %c0 = arith.constant 0 : index
    %c0_0 = arith.constant 0 : index
    %0 = vector.load %arg0[%c0, %c0_0] : memref<20x10xf32, #tpu.memory_space<vmem>>, vector<20x10xf32>
    %c0_1 = arith.constant 0 : index
    %c0_2 = arith.constant 0 : index
    %1 = vector.load %arg1[%c0_1, %c0_2] : memref<10x10xf32, #tpu.memory_space<vmem>>, vector<10x10xf32>
    %cst = arith.constant dense<0.000000e+00> : vector<20x10xf32>
    %2 = tpu.matmul %0, %1, %cst {dimension_numbers = #tpu.dot_dimension_numbers<[1], [0], [0], [1], [0, 0, 1, 1], [], []>} : vector<20x10xf32>, vector<10x10xf32>, vector<20x10xf32> -> vector<20x10xf32>
    %c0_3 = arith.constant 0 : index
    %c0_4 = arith.constant 0 : index
    %3 = vector.load %arg2[%c0_3, %c0_4] : memref<1x10xf32, #tpu.memory_space<vmem>>, vector<1x10xf32>
    %4 = vector.broadcast %3 : vector<1x10xf32> to vector<20x10xf32>
    %5 = arith.addf %2, %4 : vector<20x10xf32>
    %c0_5 = arith.constant 0 : index
    %c0_6 = arith.constant 0 : index
    %6 = vector.load %arg3[%c0_5, %c0_6] : memref<20x10xf32, #tpu.memory_space<vmem>>, vector<20x10xf32>
    %7 = arith.addf %5, %6 : vector<20x10xf32>
    %c0_7 = arith.constant 0 : index
    %c0_8 = arith.constant 0 : index
    %8 = vector.load %arg4[%c0_7, %c0_8] : memref<20x10xf32, #tpu.memory_space<vmem>>, vector<20x10xf32>
    tpu.vector_store %arg4[%c0_7, %c0_8], %7 {strides = array<i32>} : memref<20x10xf32, #tpu.memory_space<vmem>>, vector<20x10xf32>,
    return
  }
}

</mosaic_0001>

<bundles_post_ra>
// kernel: tpu_custom_call.1
= control target key start
LH: loop header
LB: loop body
LE: loop exit
PB: predicated region body
PF: predicated region fallthrough
CT: control target
= control target key end

     0   :  { %vm39_vm0 = vcmask 1041408   ;;  %v166_v0 = vmov 0.0   ;;  %vm29_vm1 = vcmask 80896   ;;  %vm167_vm2 = vmmov 0   ;;  %s234_s1 = inlined_call_operand.vmem [shape: f32[10,10], index: 1, kind: input, shape index: {}]   ;;  %s235_s0 = inlined_call_operand.vmem [shape: f32[20,10], index: 0, kind: input, shape index: {}]   ;;  %s236_s2 = inlined_call_operand.vmem [shape: f32[1,10], index: 2, kind: input, shape index: {}]   ;;  %s237_s3 = inlined_call_operand.vmem [shape: f32[20,10], index: 3, kind: input, shape index: {}]   ;;  %s238_s4 = inlined_call_operand.vmem [shape: f32[20,10], index: 4, kind: output, shape index: {}]  }
   0x1   :  { %160 = vmatprep.subr.mxu1 %v166_v0  ;;  %v21_v1 = vld [vmem:[%s234_s1 + $0x8] sm:$0x3]  ;;  %147 = vmatprep.subr.mxu0 %v166_v0  ;;  %v20_v2 = vld [vmem:[%s234_s1] sm:$0xff]  ;;  %v19_v5 = vld [vmem:[%s235_s0 + $0x10] sm:$0xf]  ;;  %vm131_vm3 = vcmask 76800  }
   0x2   :  { %162 = vmatpush3.msk.msra.mxu1 %vm39_vm0, %v21_v1  ;;  %148 = vmatpush3.msk.msra.mxu0 %vm39_vm0, %v21_v1  ;;  %v18_v3 = vld [vmem:[%s235_s0 + $0x8] sm:$0xff]  ;;  %v17_v4 = vld [vmem:[%s235_s0] sm:$0xff]  ;;  %v125_v17 = vld [vmem:[%s237_s3 + $0x10] sm:$0xf] }
   0x3   :  { %161 = vmatprep.subr.mxu1 %v166_v0  ;;  %154 = vmatprep.mubr.msk.f32.mxu1 %vm167_vm2, %v166_v0  ;;  %v137_v6 = vld [vmem:[%s236_s2] ss:$0 sm:$0xff]  ;;  %v124_v8 = vld [vmem:[%s237_s3 + $0x8] sm:$0xff] }
   0x4   :  { %163 = vmatpush3.msra.mxu1 %v20_v2  ;;  %149 = vmatprep.subr.mxu0 %v166_v0  ;;  %v123_v11 = vld [vmem:[%s237_s3] sm:$0xff] }
   0x5   :  { %155 = vmatmul.mubr.msk.f32.vlgmr.msra.gmra.mxu1 %vm29_vm1, %v18_v3  ;;  %150 = vmatpush3.msra.mxu0 %v20_v2 }
   0x6   :  { %151 = vmatprep.mubr.msk.f32.mxu0 %vm167_vm2, %v166_v0  ;;  %157 = vmatprep.mubr.msk.f32.mxu1 %vm167_vm2, %v166_v0 }
   0x7   :  { %152 = vmatmul.mubr.msk.f32.vlgmr.msra.gmra.mxu0 %vm29_vm1, %v17_v4 }
   0x9   :  { %158 = vmatmul.mubr.msk.f32.gmra.mxu1 %vm29_vm1, %v19_v5 }
  0xc5   :  { %v114_v7 = vpop.f32.mrf.mxu1 }
  0xc6   :  { %v115_v9 = vadd.f32 %v137_v6, %v114_v7 }
  0xc7   :  { %v109_v10 = vpop.f32.mrf.mxu0  ;;  %v156_v12 = vpop.f32.mrf.mxu1 }
  0xc8   :  { %v127_v13 = vadd.f32 %v124_v8, %v115_v9  ;;  %v110_v14 = vadd.f32 %v137_v6, %v109_v10 }
  0xc9   :  { %v153_v15 = vpop.f32.mrf.mxu0  ;;  %v119_v16 = vpop.f32.mrf.mxu1 }
  0xca   :  { %130 = vst.msk [vmem:[%s238_s4 + $0x8] sm:$0xff] %vm29_vm1, %v127_v13  ;;  %v126_v18 = vadd.f32 %v123_v11, %v110_v14  ;;  %v120_v19 = vadd.f32 %v137_v6, %v119_v16 }
  0xcb   :  { %v159_v20 = vpop.f32.mrf.mxu1 }
  0xcc   :  { %129 = vst.msk [vmem:[%s238_s4] sm:$0xff] %vm29_vm1, %v126_v18  ;;  %v128_v21 = vadd.f32 %v125_v17, %v120_v19 }
  0xce   :  { %132 = vst.msk [vmem:[%s238_s4 + $0x10] sm:$0xf] %vm131_vm3, %v128_v21 }

</bundles_post_ra>
